<compile_context>
chip_gen: v7x
topology: tpu7x:2x2x1
jax: 0.10.0
libtpu: 0.0.40
codegen_flags: <defaults>
</compile_context>

<pallas_src>
import functools
import math

import numpy as np
import jax
import jax.numpy as jnp
from jax.experimental import pallas as pl
from jax.experimental.pallas import tpu as pltpu


_LN_EPS = 1e-5
_ACT_DTYPE = jnp.bfloat16      # inter-kernel activations (halves HBM traffic)
_WGT_DTYPE = jnp.bfloat16      # MXU-native weights


def _tpu_vmem_capacity():
    try:
        info = pltpu.get_tpu_info()
        for attr in ("vmem_capacity_bytes", "vmem_bytes", "vmem_size_bytes"):
            v = getattr(info, attr, None)
            if v:
                return int(v)
    except Exception:
        pass
    return 64 * 1024 * 1024    # conservative default (v7x per-TensorCore VMEM)


_VMEM_CAP = _tpu_vmem_capacity()
# ~48 MiB on v7x (64 MiB physical), ~96 MiB on v5e/v6e (128 MiB physical)
_VMEM_LIMIT = min(int(_VMEM_CAP * 3 // 4), 100 * 1024 * 1024)
_TM_TARGET = 512 if _VMEM_CAP >= 96 * 1024 * 1024 else 256
_TQ_TARGET = 256               # query tile for attention
_TKI_TARGET = 2048             # d_inner reduction tile for the FFN


def _mosaic(dims):
    return pltpu.CompilerParams(dimension_semantics=dims, vmem_limit_bytes=_VMEM_LIMIT)


def _probe_single_buffered():
    """pipeline_mode=pl.Buffered(1) (no double-buffering) for never-changing weight blocks
    halves resident-weight VMEM.  Probe once on a tiny kernel; fall back silently if the
    installed jax/Mosaic does not support it so the model always runs."""
    try:
        mode = pl.Buffered(1)

        def k(w_ref, x_ref, o_ref):
            o_ref[...] = x_ref[...] + w_ref[...]

        out = pl.pallas_call(
            k,
            grid=(2,),
            in_specs=[
                pl.BlockSpec((8, 128), lambda i: (0, 0), pipeline_mode=mode),
                pl.BlockSpec((8, 128), lambda i: (i, 0)),
            ],
            out_specs=pl.BlockSpec((8, 128), lambda i: (i, 0)),
            out_shape=jax.ShapeDtypeStruct((16, 128), jnp.float32),
        )(jnp.zeros((8, 128), jnp.float32), jnp.zeros((16, 128), jnp.float32))
        jax.block_until_ready(out)
        return {"pipeline_mode": mode}
    except Exception:
        return {}


_RESIDENT = _probe_single_buffered()   # kwargs for constant-index (weight) BlockSpecs


# ----------------------------- tiling helpers ------------------------------------


def _pick_row_tile(m, target):
    """(tm, padded_M): largest tile <= target dividing (possibly padded) M, multiple of 8."""
    if m <= target:
        return m, m
    for t in range(target, 7, -1):
        if m % t == 0 and t % 8 == 0:
            return t, m
    return target, int(pl.cdiv(m, target) * target)   # pad rows (zeroed via keep_rows)


def _pick_seq_tile(length, target):
    if length <= target:
        return length
    for t in range(target, 7, -1):
        if length % t == 0 and t % 8 == 0:
            return t
    return length


def _pick_k_tile(k, target):
    if k <= target:
        return k
    for t in range(target, 127, -1):
        if k % t == 0 and t % 128 == 0:
            return t
    return k


def _pad_rows(a, m_pad):
    m = a.shape[0]
    return a if m == m_pad else jnp.pad(a, ((0, m_pad - m), (0, 0)))


def _bytes(*arrays):
    return int(sum(a.size * a.dtype.itemsize for a in arrays))


# ----------------------------- Pallas kernels ------------------------------------


def _multi_proj_kernel(*refs, n_out):
    """y_j = x @ w_j + b_j for j in 0..n_out-1 (activation read from HBM once; bf16 matmul,
    f32 accumulation)."""
    x_ref = refs[0]
    w_refs = refs[1:1 + n_out]
    b_refs = refs[1 + n_out:1 + 2 * n_out]
    o_refs = refs[1 + 2 * n_out:]
    x = x_ref[...]
    for w_ref, b_ref, o_ref in zip(w_refs, b_refs, o_refs):
        y = jnp.dot(x, w_ref[...], preferred_element_type=jnp.float32) + b_ref[...]
        o_ref[...] = y.astype(o_ref.dtype)


def _mha_attn_kernel(kpad_ref, q_ref, k_ref, v_ref, o_ref, *, n_head, d_k, d_v, causal):
    """All heads of one (batch, q-tile) block: softmax(q k^T + mask) @ v.

    The (tq, Lk) mask is built in-kernel from a (1, Lk) key-pad vector plus the global
    q-row offset (causal) -- no (B, Lq, Lk) mask DMA.  Each head's result is stored
    straight into its lane slice of o_ref (no concatenate -> bounded register liveness).
    """
    tq = q_ref.shape[1]
    lk = k_ref.shape[1]
    mask = jnp.broadcast_to(kpad_ref[0] != 0.0, (tq, lk))          # key padding (1.0 = masked)
    if causal:
        row = jax.lax.broadcasted_iota(jnp.int32, (tq, lk), 0) + pl.program_id(1) * tq
        col = jax.lax.broadcasted_iota(jnp.int32, (tq, lk), 1)
        mask = mask | (col > row)
    for h in range(n_head):                                        # static unroll over heads
        q = q_ref[0, :, h * d_k:(h + 1) * d_k]                     # (tq, dk); 1/sqrt(dk) folded into w_q
        k = k_ref[0, :, h * d_k:(h + 1) * d_k]                     # (lk, dk)
        v = v_ref[0, :, h * d_v:(h + 1) * d_v]                     # (lk, dv)
        s = jax.lax.dot_general(q, k, (((1,), (1,)), ((), ())),
                                preferred_element_type=jnp.float32)
        s = jnp.where(mask, jnp.float32(-1e30), s)
        s = s - jnp.max(s, axis=-1, keepdims=True)
        p = jnp.exp(s)
        p = p * pl.reciprocal(jnp.sum(p, axis=-1, keepdims=True), approx=True)
        o_ref[0, :, h * d_v:(h + 1) * d_v] = jnp.dot(
            p.astype(v.dtype), v, preferred_element_type=jnp.float32).astype(o_ref.dtype)


def _proj_ln_kernel(x_ref, w_ref, b_ref, res_ref, g_ref, be_ref, keep_ref, o_ref, *, eps):
    """Fused: y = LayerNorm(x @ w + b + residual) * keep_rows (pad rows zeroed)."""
    y = jnp.dot(x_ref[...], w_ref[...], preferred_element_type=jnp.float32)
    y = y + b_ref[...] + res_ref[...].astype(jnp.float32)
    mu = jnp.mean(y, axis=-1, keepdims=True)
    var = jnp.mean(jnp.square(y - mu), axis=-1, keepdims=True)
    y = (y - mu) * jax.lax.rsqrt(var + eps)
    y = y * g_ref[...] + be_ref[...]
    y = y * keep_ref[...]
    o_ref[...] = y.astype(o_ref.dtype)


def _ffn_kernel(x_ref, w1_ref, b1_ref, w2_ref, b2_ref, g_ref, be_ref, keep_ref, o_ref,
                acc_ref, *, eps):
    """FFN with the d_inner reduction streamed over grid axis 1:
       acc += relu(x @ w1[:, k-chunk] + b1[k-chunk]) @ w2[k-chunk, :]
    LayerNorm + residual + keep epilogue runs only on the last reduction step."""
    k = pl.program_id(1)

    @pl.when(k == 0)
    def _():
        acc_ref[...] = jnp.zeros_like(acc_ref)

    x = x_ref[...]
    h = jnp.dot(x, w1_ref[...], preferred_element_type=jnp.float32) + b1_ref[...]
    h = jnp.maximum(h, 0.0)
    acc_ref[...] += jnp.dot(h.astype(x.dtype), w2_ref[...], preferred_element_type=jnp.float32)

    @pl.when(k == pl.num_programs(1) - 1)
    def _():
        y = acc_ref[...] + b2_ref[...] + x.astype(jnp.float32)
        mu = jnp.mean(y, axis=-1, keepdims=True)
        var = jnp.mean(jnp.square(y - mu), axis=-1, keepdims=True)
        y = (y - mu) * jax.lax.rsqrt(var + eps)
        y = y * g_ref[...] + be_ref[...]
        y = y * keep_ref[...]
        o_ref[...] = y.astype(o_ref.dtype)


# ----------------------------- Pallas wrappers ------------------------------------


def multi_projection(x2d, ws, bs, tm_target=_TM_TARGET):
    """x2d: (M, K) bf16; ws[j]: (K, N_j) bf16; bs[j]: (N_j,) f32 -> tuple of (M, N_j) bf16."""
    M, K = x2d.shape
    n = len(ws)
    tm, m_pad = _pick_row_tile(M, tm_target)
    xp = _pad_rows(x2d, m_pad)
    ns = [int(w.shape[1]) for w in ws]
    in_specs = [pl.BlockSpec((tm, K), lambda i: (i, 0))]
    in_specs += [pl.BlockSpec((K, nj), lambda i: (0, 0), **_RESIDENT) for nj in ns]
    in_specs += [pl.BlockSpec((1, nj), lambda i: (0, 0), **_RESIDENT) for nj in ns]
    cost = pl.CostEstimate(
        flops=int(sum(2 * m_pad * K * nj for nj in ns)), transcendentals=0,
        bytes_accessed=_bytes(xp, *ws) + int(sum(4 * nj + 2 * m_pad * nj for nj in ns)))
    outs = pl.pallas_call(
        functools.partial(_multi_proj_kernel, n_out=n),
        grid=(m_pad // tm,),
        in_specs=in_specs,
        out_specs=[pl.BlockSpec((tm, nj), lambda i: (i, 0)) for nj in ns],
        out_shape=[jax.ShapeDtypeStruct((m_pad, nj), _ACT_DTYPE) for nj in ns],
        compiler_params=_mosaic(("parallel",)),
        cost_estimate=cost,
    )(xp, *ws, *[b.reshape(1, -1) for b in bs])
    return tuple(o[:M] for o in outs)


def grouped_attention(q3, k3, v3, kpad, n_head, d_k, d_v, causal):
    """q3: (B,Lq,H*dk) bf16 (scale pre-folded); k3/v3: (B,Lk,H*d*) bf16;
    kpad: (B,1,Lk) f32, 1.0 = padded (masked) key."""
    B, Lq, _ = q3.shape
    Lk = k3.shape[1]
    tq = _pick_seq_tile(Lq, _TQ_TARGET)
    cost = pl.CostEstimate(
        flops=int(2 * B * n_head * Lq * Lk * (d_k + d_v)),
        transcendentals=int(B * n_head * Lq * Lk),
        bytes_accessed=_bytes(q3, k3, v3, kpad) + int(2 * B * Lq * n_head * d_v))
    return pl.pallas_call(
        functools.partial(_mha_attn_kernel, n_head=n_head, d_k=d_k, d_v=d_v, causal=causal),
        grid=(B, Lq // tq),
        in_specs=[
            pl.BlockSpec((1, 1, Lk), lambda b, qi: (b, 0, 0)),
            pl.BlockSpec((1, tq, n_head * d_k), lambda b, qi: (b, qi, 0)),
            pl.BlockSpec((1, Lk, n_head * d_k), lambda b, qi: (b, 0, 0)),
            pl.BlockSpec((1, Lk, n_head * d_v), lambda b, qi: (b, 0, 0)),
        ],
        out_specs=pl.BlockSpec((1, tq, n_head * d_v), lambda b, qi: (b, qi, 0)),
        out_shape=jax.ShapeDtypeStruct((B, Lq, n_head * d_v), _ACT_DTYPE),
        compiler_params=_mosaic(("parallel", "parallel")),
        cost_estimate=cost,
    )(kpad, q3, k3, v3)


def out_proj_ln_pad(x2d, w, b, residual2d, gamma, beta, keep_rows, tm_target=_TM_TARGET):
    """Fused output projection + bias + residual + LayerNorm + pad-row zeroing."""
    M, K = x2d.shape
    N = int(w.shape[1])
    tm, m_pad = _pick_row_tile(M, tm_target)
    xp = _pad_rows(x2d, m_pad)
    rp = _pad_rows(residual2d, m_pad)
    kp = _pad_rows(keep_rows, m_pad)
    cost = pl.CostEstimate(flops=int(2 * m_pad * K * N), transcendentals=0,
                           bytes_accessed=_bytes(xp, w, rp, kp) + int(2 * m_pad * N + 12 * N))
    out = pl.pallas_call(
        functools.partial(_proj_ln_kernel, eps=_LN_EPS),
        grid=(m_pad // tm,),
        in_specs=[
            pl.BlockSpec((tm, K), lambda i: (i, 0)),
            pl.BlockSpec((K, N), lambda i: (0, 0), **_RESIDENT),
            pl.BlockSpec((1, N), lambda i: (0, 0), **_RESIDENT),
            pl.BlockSpec((tm, N), lambda i: (i, 0)),
            pl.BlockSpec((1, N), lambda i: (0, 0), **_RESIDENT),
            pl.BlockSpec((1, N), lambda i: (0, 0), **_RESIDENT),
            pl.BlockSpec((tm, 1), lambda i: (i, 0)),
        ],
        out_specs=pl.BlockSpec((tm, N), lambda i: (i, 0)),
        out_shape=jax.ShapeDtypeStruct((m_pad, N), _ACT_DTYPE),
        compiler_params=_mosaic(("parallel",)),
        cost_estimate=cost,
    )(xp, w, b.reshape(1, N), rp, gamma.reshape(1, N), beta.reshape(1, N), kp)
    return out[:M]


def positionwise_ffn(x, keep_rows, p, tm_target=_TM_TARGET):
    B, L, D = x.shape
    M = B * L
    d_inner = int(p["w1"].shape[1])
    tm, m_pad = _pick_row_tile(M, tm_target)
    tki = _pick_k_tile(d_inner, _TKI_TARGET)
    nk = d_inner // tki
    xp = _pad_rows(x.reshape(M, D), m_pad)
    kp = _pad_rows(keep_rows, m_pad)
    cost = pl.CostEstimate(flops=int(4 * m_pad * D * d_inner), transcendentals=0,
                           bytes_accessed=_bytes(xp, kp, p["w1"], p["w2"]) + int(4 * m_pad * D))
    out = pl.pallas_call(
        functools.partial(_ffn_kernel, eps=_LN_EPS),
        grid=(m_pad // tm, nk),
        in_specs=[
            pl.BlockSpec((tm, D), lambda i, k: (i, 0)),
            pl.BlockSpec((D, tki), lambda i, k: (0, k)),           # streamed over d_inner
            pl.BlockSpec((1, tki), lambda i, k: (0, k)),
            pl.BlockSpec((tki, D), lambda i, k: (k, 0)),           # streamed over d_inner
            pl.BlockSpec((1, D), lambda i, k: (0, 0), **_RESIDENT),
            pl.BlockSpec((1, D), lambda i, k: (0, 0), **_RESIDENT),
            pl.BlockSpec((1, D), lambda i, k: (0, 0), **_RESIDENT),
            pl.BlockSpec((tm, 1), lambda i, k: (i, 0)),
        ],
        out_specs=pl.BlockSpec((tm, D), lambda i, k: (i, 0)),
        out_shape=jax.ShapeDtypeStruct((m_pad, D), _ACT_DTYPE),
        scratch_shapes=[pltpu.VMEM((tm, D), jnp.float32)],
        compiler_params=_mosaic(("parallel", "arbitrary")),
        cost_estimate=cost,
    )(xp, p["w1"], p["b1"].reshape(1, d_inner), p["w2"], p["b2"].reshape(1, D),
      p["ln_g"].reshape(1, D), p["ln_b"].reshape(1, D), kp)
    return out[:M].reshape(B, L, D)


# ----------------------------- model glue (plain JAX) ------------------------------


def get_sinusoid_encoding_table(n_position, d_hid, padding_idx=None):
    def cal_angle(position, hid_idx):
        return position / np.power(10000, 2 * (hid_idx // 2) / d_hid)

    def get_posi_angle_vec(position):
        return [cal_angle(position, hid_j) for hid_j in range(d_hid)]

    table = np.array([get_posi_angle_vec(p) for p in range(n_position)])
    table[:, 0::2] = np.sin(table[:, 0::2])
    table[:, 1::2] = np.cos(table[:, 1::2])
    if padding_idx is not None:
        table[padding_idx] = 0.0
    return table.astype(np.float32)


def multi_head_attention(q_src, kv_src, kpad_k, keep_rows, p, causal):
    """q_src: (B, Lq, d_model); kv_src: (B, Lk, d_model); kpad_k: (B, 1, Lk) f32."""
    B, Lq, d_model = q_src.shape
    Lk = kv_src.shape[1]
    H, dk, dv = p["n_head"], p["d_k"], p["d_v"]
    x_q = q_src.reshape(B * Lq, d_model)

    if q_src is kv_src:
        # self-attention: fused QKV projection -> activation read from HBM once
        q2, k2, v2 = multi_projection(
            x_q, [p["w_q"], p["w_k"], p["w_v"]], [p["b_q"], p["b_k"], p["b_v"]])
    else:
        # cross-attention: Q on the decoder stream, fused KV on the encoder stream
        (q2,) = multi_projection(x_q, [p["w_q"]], [p["b_q"]])
        k2, v2 = multi_projection(kv_src.reshape(B * Lk, d_model),
                                  [p["w_k"], p["w_v"]], [p["b_k"], p["b_v"]])

    attn = grouped_attention(q2.reshape(B, Lq, H * dk),
                             k2.reshape(B, Lk, H * dk),
                             v2.reshape(B, Lk, H * dv),
                             kpad_k, H, dk, dv, causal)            # (B, Lq, H*dv)

    out = out_proj_ln_pad(attn.reshape(B * Lq, H * dv), p["w_o"], p["b_o"],
                          x_q, p["ln_g"], p["ln_b"], keep_rows)
    return out.reshape(B, Lq, d_model)


def decoder_layer(dec_input, encs_output, keep_rows, tgt_kpad, src_kpads, lp, causal):
    out = multi_head_attention(dec_input, dec_input, tgt_kpad, keep_rows, lp["slf_attn"],
                               causal)
    for enc_output, src_kpad, ep in zip(encs_output, src_kpads, lp["enc_attns"]):
        out = multi_head_attention(out, enc_output, src_kpad, keep_rows, ep, False)
    out = positionwise_ffn(out, keep_rows, lp["ffn"])
    return out


def multi_decoder_forward(params, tgt_seq, tgt_pos, srcs_seq, srcs_pos, encs_output,
                          use_mask=True):
    del srcs_seq  # only positions are needed for the key-pad masks
    pad = -1
    B, Lq = tgt_seq.shape

    # tiny boolean glue; attention masks are generated inside the kernel from these
    non_pad = tgt_pos != pad                                              # (B, Lq)
    keep_rows = non_pad.astype(jnp.float32).reshape(B * Lq, 1)            # 1.0 = keep row
    tgt_kpad = (~non_pad).astype(jnp.float32).reshape(B, 1, Lq)           # 1.0 = masked key
    src_kpads = [(sp == pad).astype(jnp.float32).reshape(B, 1, sp.shape[1])
                 for sp in srcs_pos]

    encs_output = [e.astype(_ACT_DTYPE) for e in encs_output]

    # embedding + sinusoidal position encoding (gather is glue; index pad+1 -> zero row)
    dec_output = (params["tgt_emb"][tgt_seq] + params["pos_table"][tgt_pos + 1]
                  ).astype(_ACT_DTYPE)

    for lp in params["layers"]:
        dec_output = decoder_layer(dec_output, encs_output, keep_rows, tgt_kpad,
                                   src_kpads, lp, bool(use_mask))
    return dec_output.astype(jnp.float32)


# ----------------------------- parameter init --------------------------------------


def init_params(key, *, n_encs, d_tgt, len_max, n_layers, n_head, d_k, d_v,
                d_model, d_inner):
    keys = iter(jax.random.split(key, 256))

    def normal(shape, std):
        return (jax.random.normal(next(keys), shape) * std).astype(jnp.float32)

    def mha_params():
        scale = 1.0 / math.sqrt(d_k)   # fold 1/sqrt(d_k) into the Q projection (free at runtime)
        return dict(
            n_head=n_head, d_k=d_k, d_v=d_v,
            w_q=(normal((d_model, n_head * d_k), np.sqrt(2.0 / (d_model + d_k)))
                 * scale).astype(_WGT_DTYPE),
            b_q=(jnp.zeros((n_head * d_k,), jnp.float32) * scale),
            w_k=normal((d_model, n_head * d_k),
                       np.sqrt(2.0 / (d_model + d_k))).astype(_WGT_DTYPE),
            b_k=jnp.zeros((n_head * d_k,), jnp.float32),
            w_v=normal((d_model, n_head * d_v),
                       np.sqrt(2.0 / (d_model + d_v))).astype(_WGT_DTYPE),
            b_v=jnp.zeros((n_head * d_v,), jnp.float32),
            w_o=normal((n_head * d_v, d_model),
                       np.sqrt(2.0 / (n_head * d_v + d_model))).astype(_WGT_DTYPE),
            b_o=jnp.zeros((d_model,), jnp.float32),
            ln_g=jnp.ones((d_model,), jnp.float32),
            ln_b=jnp.zeros((d_model,), jnp.float32),
        )

    def ffn_params():
        return dict(
            w1=normal((d_model, d_inner), np.sqrt(2.0 / (d_model + d_inner))).astype(_WGT_DTYPE),
            b1=jnp.zeros((d_inner,), jnp.float32),
            w2=normal((d_inner, d_model), np.sqrt(2.0 / (d_inner + d_model))).astype(_WGT_DTYPE),
            b2=jnp.zeros((d_model,), jnp.float32),
            ln_g=jnp.ones((d_model,), jnp.float32),
            ln_b=jnp.zeros((d_model,), jnp.float32),
        )

    params = {
        "d_model": d_model,
        "tgt_emb": normal((d_tgt, d_model), np.sqrt(2.0 / (d_tgt + d_model))),
        "pos_table": jnp.asarray(
            get_sinusoid_encoding_table(len_max + 1, d_model, padding_idx=0)),
        "layers": [
            dict(
                slf_attn=mha_params(),
                enc_attns=[mha_params() for _ in range(n_encs)],
                ffn=ffn_params(),
            )
            for _ in range(n_layers)
        ],
    }
    return params


# ----------------------------- demo / smoke test ------------------------------------


if __name__ == "__main__":
    B, Lq = 2, 8
    n_encs, n_layers, n_head = 2, 2, 2
    d_model, d_inner, d_k, d_v = 32, 64, 16, 16
    d_tgt, len_max = 10, 16
    src_lens = [8, 16]

    key = jax.random.PRNGKey(0)
    k_params, k_tgt, k_src, k_enc = jax.random.split(key, 4)

    params = init_params(
        k_params, n_encs=n_encs, d_tgt=d_tgt, len_max=len_max, n_layers=n_layers,
        n_head=n_head, d_k=d_k, d_v=d_v, d_model=d_model, d_inner=d_inner)

    # target tokens / positions (pad = -1 marks padded positions)
    tgt_seq = jax.random.randint(k_tgt, (B, Lq), 0, d_tgt)
    tgt_pos = jnp.broadcast_to(jnp.arange(Lq, dtype=jnp.int32), (B, Lq))
    tgt_pos = tgt_pos.at[1, -2:].set(-1)   # pad last 2 positions of batch element 1

    srcs_seq, srcs_pos, encs_output = [], [], []
    src_keys = jax.random.split(k_src, n_encs)
    enc_keys = jax.random.split(k_enc, n_encs)
    for e in range(n_encs):
        Lk = src_lens[e]
        srcs_seq.append(jax.random.randint(src_keys[e], (B, Lk), 0, d_tgt))
        pos = jnp.broadcast_to(jnp.arange(Lk, dtype=jnp.int32), (B, Lk))
        pos = pos.at[0, -1:].set(-1)       # pad last source position of batch element 0
        srcs_pos.append(pos)
        encs_output.append(
            (jax.random.normal(enc_keys[e], (B, Lk, d_model)) * 0.1).astype(jnp.float32))

    out = multi_decoder_forward(params, tgt_seq, tgt_pos, srcs_seq, srcs_pos,
                                encs_output, use_mask=True)
    jax.block_until_ready(out)
    assert out.shape == (B, Lq, d_model)
    assert bool(jnp.all(jnp.isfinite(out)))
    print("KERNEL_OK")
</pallas_src>

<mosaic_0001>
module attributes {stable_mosaic.version = 11 : i64} {
  func.func @k(%arg0: i32, %arg1: memref<8x128xf32, #tpu.memory_space<vmem>>, %arg2: memref<8x128xf32, #tpu.memory_space<vmem>>, %arg3: memref<8x128xf32, #tpu.memory_space<vmem>>) attributes {dimension_semantics = [#tpu.dimension_semantics<arbitrary>], iteration_bounds = array<i64: 2>, scalar_prefetch = 0 : i64, scratch_operands = 0 : i64, tpu.core_type = #tpu.core_type<tc>, window_params = [{pipeline_mode = #tpu.pipeline_mode<synchronous>, transform_indices = @transform_0, window_bounds = array<i64: 8, 128>}, {transform_indices = @transform_1, window_bounds = array<i64: 8, 128>}, {transform_indices = @transform_2, window_bounds = array<i64: 8, 128>}]} {
    %c0 = arith.constant 0 : index
    %c0_0 = arith.constant 0 : index
    %0 = vector.load %arg2[%c0, %c0_0] : memref<8x128xf32, #tpu.memory_space<vmem>>, vector<8x128xf32>
    %c0_1 = arith.constant 0 : index
    %c0_2 = arith.constant 0 : index
    %1 = vector.load %arg1[%c0_1, %c0_2] : memref<8x128xf32, #tpu.memory_space<vmem>>, vector<8x128xf32>
    %2 = arith.addf %0, %1 : vector<8x128xf32>
    %c0_3 = arith.constant 0 : index
    %c0_4 = arith.constant 0 : index
    %3 = vector.load %arg3[%c0_3, %c0_4] : memref<8x128xf32, #tpu.memory_space<vmem>>, vector<8x128xf32>
    tpu.vector_store %arg3[%c0_3, %c0_4], %2 {strides = array<i32>} : memref<8x128xf32, #tpu.memory_space<vmem>>, vector<8x128xf32>,
    return
  }
  func.func @transform_0(%arg0: i32) -> (i32, i32) {
    %c0_i32 = arith.constant 0 : i32
    %c0_i32_0 = arith.constant 0 : i32
    %c0_i32_1 = arith.constant 0 : i32
    return %c0_i32, %c0_i32_0 : i32, i32
  }
  func.func @transform_1(%arg0: i32) -> (i32, i32) {
    %c0_i32 = arith.constant 0 : i32
    %c0_i32_0 = arith.constant 0 : i32
    return %arg0, %c0_i32 : i32, i32
  }
  func.func @transform_2(%arg0: i32) -> (i32, i32) {
    %c0_i32 = arith.constant 0 : i32
    %c0_i32_0 = arith.constant 0 : i32
    return %arg0, %c0_i32 : i32, i32
  }
}

module attributes {stable_mosaic.version = 11 : i64} {
  func.func @_multi_proj_kernel(%arg0: i32, %arg1: memref<16x32xbf16, #tpu.memory_space<vmem>>, %arg2: memref<32x32xbf16, #tpu.memory_space<vmem>>, %arg3: memref<32x32xbf16, #tpu.memory_space<vmem>>, %arg4: memref<32x32xbf16, #tpu.memory_space<vmem>>, %arg5: memref<1x32xf32, #tpu.memory_space<vmem>>, %arg6: memref<1x32xf32, #tpu.memory_space<vmem>>, %arg7: memref<1x32xf32, #tpu.memory_space<vmem>>, %arg8: memref<16x32xbf16, #tpu.memory_space<vmem>>, %arg9: memref<16x32xbf16, #tpu.memory_space<vmem>>, %arg10: memref<16x32xbf16, #tpu.memory_space<vmem>>) attributes {dimension_semantics = [#tpu.dimension_semantics<parallel>], iteration_bounds = array<i64: 1>, scalar_prefetch = 0 : i64, scratch_operands = 0 : i64, tpu.core_type = #tpu.core_type<tc>, window_params = [{transform_indices = @transform_0, window_bounds = array<i64: 16, 32>}, {pipeline_mode = #tpu.pipeline_mode<synchronous>, transform_indices = @transform_1, window_bounds = array<i64: 32, 32>}, {pipeline_mode = #tpu.pipeline_mode<synchronous>, transform_indices = @transform_2, window_bounds = array<i64: 32, 32>}, {pipeline_mode = #tpu.pipeline_mode<synchronous>, transform_indices = @transform_3, window_bounds = array<i64: 32, 32>}, {pipeline_mode = #tpu.pipeline_mode<synchronous>, transform_indices = @transform_4, window_bounds = array<i64: 1, 32>}, {pipeline_mode = #tpu.pipeline_mode<synchronous>, transform_indices = @transform_5, window_bounds = array<i64: 1, 32>}, {pipeline_mode = #tpu.pipeline_mode<synchronous>, transform_indices = @transform_6, window_bounds = array<i64: 1, 32>}, {transform_indices = @transform_7, window_bounds = array<i64: 16, 32>}, {transform_indices = @transform_8, window_bounds = array<i64: 16, 32>}, {transform_indices = @transform_9, window_bounds = array<i64: 16, 32>}]} {
    %c0 = arith.constant 0 : index
    %c0_0 = arith.constant 0 : index
    %0 = vector.load %arg1[%c0, %c0_0] : memref<16x32xbf16, #tpu.memory_space<vmem>>, vector<16x32xbf16>
    %c0_1 = arith.constant 0 : index
    %c0_2 = arith.constant 0 : index
    %1 = vector.load %arg2[%c0_1, %c0_2] : memref<32x32xbf16, #tpu.memory_space<vmem>>, vector<32x32xbf16>
    %cst = arith.constant dense<0.000000e+00> : vector<16x32xf32>
    %2 = tpu.matmul %0, %1, %cst {dimension_numbers = #tpu.dot_dimension_numbers<[1], [0], [0], [1], [0, 0, 1, 1], [], []>} : vector<16x32xbf16>, vector<32x32xbf16>, vector<16x32xf32> -> vector<16x32xf32>
    %c0_3 = arith.constant 0 : index
    %c0_4 = arith.constant 0 : index
    %3 = vector.load %arg5[%c0_3, %c0_4] : memref<1x32xf32, #tpu.memory_space<vmem>>, vector<1x32xf32>
    %4 = vector.broadcast %3 : vector<1x32xf32> to vector<16x32xf32>
    %5 = arith.addf %2, %4 : vector<16x32xf32>
    %6 = arith.truncf %5 : vector<16x32xf32> to vector<16x32xbf16>
    %c0_5 = arith.constant 0 : index
    %c0_6 = arith.constant 0 : index
    %7 = vector.load %arg8[%c0_5, %c0_6] : memref<16x32xbf16, #tpu.memory_space<vmem>>, vector<16x32xbf16>
    tpu.vector_store %arg8[%c0_5, %c0_6], %6 {strides = array<i32>} : memref<16x32xbf16, #tpu.memory_space<vmem>>, vector<16x32xbf16>,
    %c0_7 = arith.constant 0 : index
    %c0_8 = arith.constant 0 : index
    %8 = vector.load %arg3[%c0_7, %c0_8] : memref<32x32xbf16, #tpu.memory_space<vmem>>, vector<32x32xbf16>
    %cst_9 = arith.constant dense<0.000000e+00> : vector<16x32xf32>
    %9 = tpu.matmul %0, %8, %cst_9 {dimension_numbers = #tpu.dot_dimension_numbers<[1], [0], [0], [1], [0, 0, 1, 1], [], []>} : vector<16x32xbf16>, vector<32x32xbf16>, vector<16x32xf32> -> vector<16x32xf32>
    %c0_10 = arith.constant 0 : index
    %c0_11 = arith.constant 0 : index
    %10 = vector.load %arg6[%c0_10, %c0_11] : memref<1x32xf32, #tpu.memory_space<vmem>>, vector<1x32xf32>
    %11 = vector.broadcast %10 : vector<1x32xf32> to vector<16x32xf32>
    %12 = arith.addf %9, %11 : vector<16x32xf32>
    %13 = arith.truncf %12 : vector<16x32xf32> to vector<16x32xbf16>
    %c0_12 = arith.constant 0 : index
    %c0_13 = arith.constant 0 : index
    %14 = vector.load %arg9[%c0_12, %c0_13] : memref<16x32xbf16, #tpu.memory_space<vmem>>, vector<16x32xbf16>
    tpu.vector_store %arg9[%c0_12, %c0_13], %13 {strides = array<i32>} : memref<16x32xbf16, #tpu.memory_space<vmem>>, vector<16x32xbf16>,
    %c0_14 = arith.constant 0 : index
    %c0_15 = arith.constant 0 : index
    %15 = vector.load %arg4[%c0_14, %c0_15] : memref<32x32xbf16, #tpu.memory_space<vmem>>, vector<32x32xbf16>
    %cst_16 = arith.constant dense<0.000000e+00> : vector<16x32xf32>
    %16 = tpu.matmul %0, %15, %cst_16 {dimension_numbers = #tpu.dot_dimension_numbers<[1], [0], [0], [1], [0, 0, 1, 1], [], []>} : vector<16x32xbf16>, vector<32x32xbf16>, vector<16x32xf32> -> vector<16x32xf32>
    %c0_17 = arith.constant 0 : index
    %c0_18 = arith.constant 0 : index
    %17 = vector.load %arg7[%c0_17, %c0_18] : memref<1x32xf32, #tpu.memory_space<vmem>>, vector<1x32xf32>
    %18 = vector.broadcast %17 : vector<1x32xf32> to vector<16x32xf32>
    %19 = arith.addf %16, %18 : vector<16x32xf32>
    %20 = arith.truncf %19 : vector<16x32xf32> to vector<16x32xbf16>
    %c0_19 = arith.constant 0 : index
    %c0_20 = arith.constant 0 : index
    %21 = vector.load %arg10[%c0_19, %c0_20] : memref<16x32xbf16, #tpu.memory_space<vmem>>, vector<16x32xbf16>
    tpu.vector_store %arg10[%c0_19, %c0_20], %20 {strides = array<i32>} : memref<16x32xbf16, #tpu.memory_space<vmem>>, vector<16x32xbf16>,
    return
  }
  func.func @transform_0(%arg0: i32) -> (i32, i32) {
    %c0_i32 = arith.constant 0 : i32
    %c0_i32_0 = arith.constant 0 : i32
    return %arg0, %c0_i32 : i32, i32
  }
  func.func @transform_1(%arg0: i32) -> (i32, i32) {
    %c0_i32 = arith.constant 0 : i32
    %c0_i32_0 = arith.constant 0 : i32
    %c0_i32_1 = arith.constant 0 : i32
    return %c0_i32, %c0_i32_0 : i32, i32
  }
  func.func @transform_2(%arg0: i32) -> (i32, i32) {
    %c0_i32 = arith.constant 0 : i32
    %c0_i32_0 = arith.constant 0 : i32
    %c0_i32_1 = arith.constant 0 : i32
    return %c0_i32, %c0_i32_0 : i32, i32
  }
  func.func @transform_3(%arg0: i32) -> (i32, i32) {
    %c0_i32 = arith.constant 0 : i32
    %c0_i32_0 = arith.constant 0 : i32
    %c0_i32_1 = arith.constant 0 : i32
    return %c0_i32, %c0_i32_0 : i32, i32
  }
  func.func @transform_4(%arg0: i32) -> (i32, i32) {
    %c0_i32 = arith.constant 0 : i32
    %c0_i32_0 = arith.constant 0 : i32
    %c0_i32_1 = arith.constant 0 : i32
    return %c0_i32, %c0_i32_0 : i32, i32
  }
  func.func @transform_5(%arg0: i32) -> (i32, i32) {
    %c0_i32 = arith.constant 0 : i32
    %c0_i32_0 = arith.constant 0 : i32
    %c0_i32_1 = arith.constant 0 : i32
    return %c0_i32, %c0_i32_0 : i32, i32
  }
  func.func @transform_6(%arg0: i32) -> (i32, i32) {
    %c0_i32 = arith.constant 0 : i32
    %c0_i32_0 = arith.constant 0 : i32
    %c0_i32_1 = arith.constant 0 : i32
    return %c0_i32, %c0_i32_0 : i32, i32
  }
  func.func @transform_7(%arg0: i32) -> (i32, i32) {
    %c0_i32 = arith.constant 0 : i32
    %c0_i32_0 = arith.constant 0 : i32
    return %arg0, %c0_i32 : i32, i32
  }
  func.func @transform_8(%arg0: i32) -> (i32, i32) {
    %c0_i32 = arith.constant 0 : i32
    %c0_i32_0 = arith.constant 0 : i32
    return %arg0, %c0_i32 : i32, i32
  }
  func.func @transform_9(%arg0: i32) -> (i32, i32) {
    %c0_i32 = arith.constant 0 : i32
    %c0_i32_0 = arith.constant 0 : i32
    return %arg0, %c0_i32 : i32, i32
  }
}

</mosaic_0001>

<bundles_post_ra>
// kernel: tpu_custom_call.1
= control target key start
LH: loop header
LB: loop body
LE: loop exit
PB: predicated region body
PF: predicated region fallthrough
CT: control target
= control target key end

     0   :  { %7 = vsyncpa [#allocation3], 0  ;;  %s692_s0 = inlined_call_operand.hbm [shape: f32[8,128], index: 0, kind: input, shape index: {}]   ;;  %s693_s1 = inlined_call_operand.hbm [shape: f32[16,128], index: 1, kind: input, shape index: {}]   ;;  %s694_s2 = inlined_call_operand.hbm [shape: f32[16,128], index: 2, kind: output, shape index: {}]  }
   0x1   :  { %8 = vsyncpa [#allocation6], 0 }
   0x2   :  { %10 = vsyncpa [#allocation6 + $0x1], 0 }
   0x3   :  { %11 = vsyncpa [#allocation4], 0 }
   0x4   :  { %13 = vsyncpa [#allocation4 + $0x1], 0  ;;  %s491_s9 = smov 0   ;;  %s493_s10 = smov 0  }
   0x5   :  { %s495_s11 = smov 0   ;;  %s497_s12 = smov 0  }
   0x6 LB: > { %s512_s13 = sadd.s32 4294967295, %s471_s12   ;;  %s272_s14 = sadd.s32 4294967294, %s471_s12   ;;  %s471_s12 = sphi %s497_s12, %s718_s12   ;;  %s467_s11 = sphi %s495_s11, %s717_s11   ;;  %s463_s10 = sphi %s493_s10, %s716_s10   ;;  %s459_s9 = sphi %s491_s9, %s715_s9  }
   0x7   : > { %p60_p0 = scmp.ne.s32.totalorder %s463_s10, %s459_s9  ;;  %p695_p1 = scmp.eq.s32.totalorder %s512_s13, 0 }
   0x8   : > { %p90_p3 = scmp.eq.s32.totalorder %s272_s14, 1  ;;  %p273_p5 = scmp.ge.s32.totalorder %s471_s12, 1 }
   0x9   : > { %p521_p4 = por %p695_p1, %p60_p0  ;;  %p97_p7 = scmp.lt.s32.totalorder %s471_s12, 3 }
   0xa   : > { %p526_p6 = por %p90_p3, %p60_p0  ;;  %s473_s18 = smov [#allocation2]  }
   0xb   : > { %s698_s15 = scalar_select %p521_p4, 1, 0 }
   0xc   : > { %s699_s16 = scalar_select %p526_p6, 1, 0 }
   0xd   : > { %p531_p8 = pnand %p273_p5, %p97_p7  ;;  %s110_s19 = sshll.u32 %s473_s18, 4  ;;  %s111_s19 = int_to_ptr.vmem [resolvable:$true] %s110_s19 }
   0xe   : > { %s539_s20 = sadd.s32 1, %s471_s12   ;;  %s47_s24 = sadd.s32 1, %s467_s11 }
   0xf   : > { %s700_s17 = scalar_select %p531_p8, 1, 0 }
  0x10   : > { %p294_p10 = pneg %p531_p8  ;;  %s44_s22 = ssub.s32 %s471_s12, %s539_s20 }
  0x11   : > { %p549_p12 = scmp.eq.s32.totalorder %s44_s22, 0  ;;  %s343_s27 = scalar_lea.hbm %s692_s0, 128 }
  0x12   : > { %p543_p11 = pnand %p294_p10, %p695_p1  ;;  %p344_p0 = scmp.ne.s32.totalorder %s692_s0, %s343_s27 }
  0x13   : > { %s702_s23 = scalar_select %p549_p12, 1, 0 }
  0x14   : > { %p345_p3 = pneg %p543_p11  ;;  %p350_p10 = scmp.lt.u32.totalorder %s343_s27, %s692_s0 }
  0x16   : > { %p346_p5 = pnand %p345_p3, %p344_p0 }
  0x18   : > { %p347_p7 = pneg %p346_p5 }
  0x1a   : > { %p352_p9 = pnand %p350_p10, %p347_p7 }
  0x1c   : > { %355 = shalt.err (!%p352_p9)
}
  0x1d   : > { %s356_s4 = scalar_lea.vmem %s111_s19, 128  ;;  %p364_p6 = scmp.lt.s32.totalorder %s111_s19, %s111_s19 }
  0x1e   : > { %p357_p1 = scmp.ne.s32.totalorder %s111_s19, %s356_s4  ;;  %p365_p4 = scmp.lt.s32.totalorder %s356_s4, %s356_s4 }
  0x20   : > { %p359_p2 = pnand %p357_p1, %p345_p3  ;;  %p366_p8 = por %p365_p4, %p364_p6 }
  0x22   : > { %p360_p13 = pneg %p359_p2 }
  0x24   : > { %p367_p12 = pnand %p366_p8, %p360_p13 }
  0x26   : > { %370 = shalt.err (!%p367_p12)
}
  0x27   : > { %297 = dma.hbm_to_vmem [thread:$0]  (!%p543_p11), %s692_s0, 128, %s111_s19, [#allocation3]  }
  0x28   : > { %p703_p1 = scmp.ne.s32.totalorder %s702_s23, 0  ;;  %p55_p2 = scmp.eq.s32.totalorder %s471_s12, 0 }
  0x29   : > { %p704_p4 = scmp.ne.s32.totalorder %s467_s11, %s463_s10  ;;  %p705_p6 = scmp.eq.s32.totalorder %s512_s13, 1 }
  0x2a   : > { %s575_s7 = scalar_select %p703_p1, %s467_s11, %s47_s24  }
  0x2b   : > { %p583_p8 = por %p705_p6, %p704_p4  ;;  %p307_p9 = scmp.lt.s32.totalorder %s471_s12, 2 }
  0x2c   : > { %s121_s14 = sand.u32 1, %s467_s11   ;;  %p707_p12 = pmov %p704_p4 }
  0x2d   : > { %s276_s18 = sshll.u32 %s121_s14, 3  ;;  %s277_s21 = sshll.u32 %s471_s12, 7 }
  0x2e   : > { %p56_p13 = por %p55_p2, %p707_p12  ;;  %s596_s19 = scalar_lea.hbm %s693_s1, %s277_s21 }
  0x2f   : > { %s125_s23 = scalar_lea.vmem [#allocation5], %s276_s18  ;;  %s122_s27 = scalar_lea.sflag [#allocation6], %s121_s14 }
  0x30   : > { %s132_s24 = sshll.u32 %s125_s23, 4  ;;  %p598_p11 = pnand %p307_p9, %p56_p13  ;;  %s602_s24 = int_to_ptr.vmem [resolvable:$true] %s132_s24 }
  0x31   : > { %s371_s28 = scalar_lea.hbm %s596_s19, 128  ;;  %s376_s3 = scalar_lea.hbm %s693_s1, 256 }
  0x32   : > { %p372_p0 = scmp.ne.s32.totalorder %s596_s19, %s371_s28  ;;  %p373_p3 = pneg %p598_p11 }
  0x33   : > { %p377_p10 = scmp.lt.u32.totalorder %s596_s19, %s693_s1  ;;  %p378_p1 = scmp.lt.u32.totalorder %s376_s3, %s371_s28 }
  0x34   : > { %p374_p5 = pnand %p373_p3, %p372_p0  ;;  %p380_p4 = scmp.lt.u32.totalorder %s371_s28, %s596_s19 }
  0x35   : > { %p379_p2 = por %p378_p1, %p377_p10 }
  0x36   : > { %p375_p7 = pneg %p374_p5 }
  0x37   : > { %p381_p6 = por %p380_p4, %p379_p2 }
  0x39   : > { %p382_p9 = pnand %p381_p6, %p375_p7 }
  0x3b   : > { %385 = shalt.err (!%p382_p9)
}
  0x3c   : > { %s386_s6 = scalar_lea.vmem %s602_s24, 128  ;;  %s474_s14 = smov [#allocation5]  }
  0x3d   : > { %p387_p12 = scmp.ne.s32.totalorder %s602_s24, %s386_s6  ;;  %s391_s18 = sshll.u32 %s474_s14, 4  ;;  %s392_s18 = int_to_ptr.vmem [resolvable:$false] %s391_s18 }
  0x3e   : > { %s393_s21 = scalar_lea.vmem %s392_s18, 256  ;;  %p394_p5 = scmp.lt.s32.totalorder %s602_s24, %s392_s18 }
  0x3f   : > { %p389_p13 = pnand %p387_p12, %p373_p3  ;;  %p395_p10 = scmp.lt.s32.totalorder %s393_s21, %s386_s6 }
  0x41   : > { %p390_p0 = pneg %p389_p13  ;;  %p396_p1 = por %p395_p10, %p394_p5 }
  0x43   : > { %p397_p2 = pnand %p396_p1, %p390_p0 }
  0x45   : > { %400 = shalt.err (!%p397_p2)
}
  0x46   : > { %301 = dma.hbm_to_vmem [thread:$0]  (!%p598_p11), %s596_s19, 128, %s602_s24, %s122_s27  }
  0x47   : > { %p709_p7 = scmp.ne.s32.totalorder %s700_s17, 0 }
  0x48   : > { %p710_p3 = scmp.eq.s32.totalorder (!%p709_p7), %s512_s13, 0 }
  0x49   : > { %141 = sbr.rel (%p709_p7) target bundleno = 110 (0x6e), region = 28 }
  0x50   : > { %446 = dma.done.wait (%p710_p3), [#allocation3], 128   ;;  %p711_p4 = pmov %p710_p3 }
  0x51   : > { %s636_s22 = sand.u32 1, %s463_s10   ;;  %p712_p6 = scmp.ne.s32.totalorder %s698_s15, 0 }
  0x52   : > { %448 = vsyncadd (%p711_p4), [#allocation3], 4294967168  ;;  %s280_s25 = sshll.u32 %s636_s22, 3  ;;  %s148_s23 = scalar_lea.sflag [#allocation6], %s636_s22 }
  0x53   : > { %s151_s26 = scalar_lea.vmem [#allocation5], %s280_s25 }
  0x54   : > { %450 = dma.done.wait (%p712_p6), %s148_s23, 128  }
  0x55   : > { %452 = vsyncadd (%p712_p6), %s148_s23, 4294967168  ;;  %s171_s17 = scalar_lea.vmem [#allocation7], %s280_s25  ;;  %s283_s24 = sshll.u32 %s512_s13, 7  ;;  %v172_v0 = vld [vmem:[%s151_s26] sm:$0xff]  ;;  %v173_v1 = vld [vmem:[#allocation2] sm:$0xff] }
  0x56   : > { %s190_s19 = sshll.u32 %s171_s17, 4  ;;  %v174_v2 = vadd.f32 %v173_v1, %v172_v0  ;;  %s650_s29 = scalar_lea.hbm %s694_s2, %s283_s24  ;;  %s645_s19 = int_to_ptr.vmem [resolvable:$true] %s190_s19 }
  0x57   : > { %s177_s15 = scalar_lea.sflag [#allocation4], %s636_s22  ;;  %s401_s30 = scalar_lea.vmem %s645_s19, 128 }
  0x58   : > { %175 = vst [vmem:[%s171_s17] sm:$0xff] %v174_v2  ;;  %p402_p11 = scmp.ne.s32.totalorder %s645_s19, %s401_s30  ;;  %s475_s13 = smov [#allocation7]  }
  0x59   : > { %s405_s3 = sshll.u32 %s475_s13, 4  ;;  %s406_s3 = int_to_ptr.vmem [resolvable:$false] %s405_s3 }
  0x5a   : > { %p403_p9 = pnand %p402_p11, %p583_p8  ;;  %s407_s4 = scalar_lea.vmem %s406_s3, 256 }
  0x5b   : > { %p408_p13 = scmp.lt.s32.totalorder %s645_s19, %s406_s3  ;;  %p409_p0 = scmp.lt.s32.totalorder %s407_s4, %s401_s30 }
  0x5c   : > { %p404_p12 = pneg %p403_p9 }
  0x5d   : > { %p410_p5 = por %p409_p0, %p408_p13 }
  0x5f   : > { %p411_p10 = pnand %p410_p5, %p404_p12 }
  0x61   : > { %414 = shalt.err (!%p411_p10)
}
  0x62   : > { %s415_s5 = scalar_lea.hbm %s650_s29, 128  ;;  %s419_s18 = scalar_lea.hbm %s694_s2, 256 }
  0x63   : > { %p416_p1 = scmp.ne.s32.totalorder %s650_s29, %s415_s5  ;;  %p420_p3 = scmp.lt.u32.totalorder %s650_s29, %s694_s2 }
  0x64   : > { %p421_p4 = scmp.lt.u32.totalorder %s419_s18, %s415_s5  ;;  %p423_p11 = scmp.lt.u32.totalorder %s415_s5, %s650_s29 }
  0x65   : > { %p417_p2 = pnand %p416_p1, %p583_p8 }
  0x66   : > { %p422_p6 = por %p421_p4, %p420_p3 }
  0x67   : > { %p418_p7 = pneg %p417_p2 }
  0x68   : > { %p424_p9 = por %p423_p11, %p422_p6 }
  0x6a   : > { %p425_p12 = pnand %p424_p9, %p418_p7 }
  0x6c   : > { %428 = shalt.err (!%p425_p12)
}
  0x6d   : > { %292 = dma.vmem_to_hbm [thread:$0]  (%p583_p8), %s645_s19, 128, %s650_s29, %s177_s15  }
  0x6e PF: > { %s202_s25 = sand.u32 1, %s459_s9   ;;  %p713_p13 = scmp.ne.s32.totalorder %s699_s16, 0 }
  0x6f   : > { %p714_p0 = scmp.ge.s32.totalorder %s471_s12, 2  ;;  %s203_s23 = scalar_lea.sflag [#allocation4], %s202_s25 }
  0x71   : > { %p303_p5 = pnand %p714_p0, %p713_p13 }
  0x73   : > { %454 = dma.done.wait (!%p303_p5), %s203_s23, 128  }
  0x74   : > { %456 = vsyncadd (!%p303_p5), %s203_s23, 4294967168  ;;  %p16_p10 = scmp.ge.s32.totalorder %s539_s20, 4   ;;  %s715_s9 = smov %s463_s10 }
  0x75   : > { %s716_s10 = smov %s467_s11  ;;  %s717_s11 = smov %s575_s7 }
  0x76   : > { %s718_s12 = smov %s539_s20  ;;  %18 = sbr.rel (!%p16_p10) target bundleno = 6 (0x6), region = 78 }
  0x7d   :  { %208 = vsyncpa [#allocation3], 1 }
  0x7e   :  { %210 = vsyncpa [#allocation3 + $0x1], 1 }
  0x7f   :  { %211 = vsyncpa [#allocation6], 1 }
  0x80   :  { %213 = vsyncpa [#allocation6 + $0x1], 1 }
  0x81   :  { %214 = vsyncpa [#allocation4], 1 }
  0x82   :  { %216 = vsyncpa [#allocation4 + $0x1], 1 }

// kernel: tpu_custom_call.1
= control target key start
LH: loop header
LB: loop body
LE: loop exit
PB: predicated region body
PF: predicated region fallthrough
CT: control target
= control target key end

     0   :  { %15 = vsyncpa [#allocation3], 0  ;;  %s816_s0 = inlined_call_operand.hbm [shape: bf16[16,32], index: 0, kind: input, shape index: {}]   ;;  %s817_s1 = inlined_call_operand.hbm [shape: bf16[32,32], index: 1, kind: input, shape index: {}]   ;;  %s818_s2 = inlined_call_operand.hbm [shape: bf16[32,32], index: 2, kind: input, shape index: {}]   ;;  %s819_s3 = inlined_call_operand.hbm [shape: bf16[32,32], index: 3, kind: input, shape index: {}]   ;;  %s820_s4 = inlined_call_operand.vmem [shape: f32[1,32], index: 4, kind: input, shape index: {}]   ;;  %s821_s5 = inlined_call_operand.vmem [shape: f32[1,32], index: 5, kind: input, shape index: {}]   ;;  %s822_s6 = inlined_call_operand.vmem [shape: f32[1,32], index: 6, kind: input, shape index: {}]   ;;  %s823_s7 = inlined_call_operand.hbm [shape: bf16[16,32], index: 7, kind: output, shape index: {0}]   ;;  %s824_s8 = inlined_call_operand.hbm [shape: bf16[16,32], index: 8, kind: output, shape index: {1}]   ;;  %s825_s9 = inlined_call_operand.hbm [shape: bf16[16,32], index: 9, kind: output, shape index: {2}]  }
   0x1   :  { %16 = vsyncpa [#allocation6], 0 }
   0x2   :  { %17 = vsyncpa [#allocation9], 0 }
   0x3   :  { %18 = vsyncpa [#allocation4], 0 }
   0x4   :  { %19 = vsyncpa [#allocation12], 0  ;;  %s611_s30 = smov [#allocation5]   ;;  %s612_s11 = smov [#allocation2]  }
   0x5   :  { %s37_s10 = sshll.u32 %s611_s30, 4  ;;  %s25_s12 = sshll.u32 %s612_s11, 4  ;;  %s38_s10 = int_to_ptr.vmem [resolvable:$true] %s37_s10  ;;  %s672_s12 = int_to_ptr.vmem [resolvable:$true] %s25_s12 }
   0x6   :  { %s447_s15 = scalar_lea.hbm %s817_s1, 256 }
   0x7   :  { %p448_p0 = scmp.ne.s32.totalorder %s817_s1, %s447_s15  ;;  %p451_p1 = scmp.lt.u32.totalorder %s447_s15, %s817_s1 }
   0x9   :  { %p453_p2 = pnand %p451_p1, %p448_p0 }
   0xb   :  { %456 = shalt.err (!%p453_p2)
}
   0xc   :  { %s457_s20 = scalar_lea.vmem %s38_s10, 256  ;;  %p462_p4 = scmp.lt.s32.totalorder %s38_s10, %s38_s10 }
   0xd   :  { %p458_p3 = scmp.ne.s32.totalorder %s38_s10, %s457_s20  ;;  %p463_p5 = scmp.lt.s32.totalorder %s457_s20, %s457_s20 }
   0xf   :  { %p464_p6 = por %p463_p5, %p462_p4 }
  0x11   :  { %p465_p7 = pnand %p464_p6, %p458_p3 }
  0x13   :  { %468 = shalt.err (!%p465_p7)
}
  0x14   :  { %s613_s21 = smov 64   ;;  %s614_s22 = smov 4  }
  0x15   :  { %43 = dma.hbm_to_vmem [thread:$0]  %s817_s1, 256, %s38_s10, [#allocation6], %s613_s21, %s613_s21, %s614_s22  }
  0x16   :  { %s469_s27 = scalar_lea.hbm %s816_s0, 128 }
  0x17   :  { %p470_p8 = scmp.ne.s32.totalorder %s816_s0, %s469_s27  ;;  %p473_p9 = scmp.lt.u32.totalorder %s469_s27, %s816_s0 }
  0x19   :  { %p475_p10 = pnand %p473_p9, %p470_p8 }
  0x1b   :  { %478 = shalt.err (!%p475_p10)
}
  0x1c   :  { %s479_s13 = scalar_lea.vmem %s672_s12, 128  ;;  %p484_p12 = scmp.lt.s32.totalorder %s672_s12, %s672_s12 }
  0x1d   :  { %p480_p11 = scmp.ne.s32.totalorder %s672_s12, %s479_s13  ;;  %p485_p13 = scmp.lt.s32.totalorder %s479_s13, %s479_s13 }
  0x1f   :  { %p486_p0 = por %p485_p13, %p484_p12 }
  0x21   :  { %p487_p1 = pnand %p486_p0, %p480_p11 }
  0x23   :  { %490 = shalt.err (!%p487_p1)
}
  0x24   :  { %31 = dma.hbm_to_vmem [thread:$0]  %s816_s0, 128, %s672_s12, [#allocation3], %s613_s21, %s613_s21, %s614_s22  }
  0x25   :  { %s615_s14 = smov [#allocation7]   ;;  %s616_s16 = smov [#allocation8]  }
  0x26   :  { %s49_s15 = sshll.u32 %s615_s14, 4  ;;  %s61_s17 = sshll.u32 %s616_s16, 4  ;;  %s50_s15 = int_to_ptr.vmem [resolvable:$true] %s49_s15  ;;  %s709_s17 = int_to_ptr.vmem [resolvable:$true] %s61_s17 }
  0x27   :  { %s491_s20 = scalar_lea.hbm %s818_s2, 256 }
  0x28   :  { %p492_p2 = scmp.ne.s32.totalorder %s818_s2, %s491_s20  ;;  %p495_p3 = scmp.lt.u32.totalorder %s491_s20, %s818_s2 }
  0x2a   :  { %p497_p4 = pnand %p495_p3, %p492_p2 }
  0x2c   :  { %500 = shalt.err (!%p497_p4)
}
  0x2d   :  { %s501_s0 = scalar_lea.vmem %s50_s15, 256  ;;  %p506_p6 = scmp.lt.s32.totalorder %s50_s15, %s50_s15 }
  0x2e   :  { %p502_p5 = scmp.ne.s32.totalorder %s50_s15, %s501_s0  ;;  %p507_p7 = scmp.lt.s32.totalorder %s501_s0, %s501_s0 }
  0x30   :  { %p508_p8 = por %p507_p7, %p506_p6 }
  0x32   :  { %p509_p9 = pnand %p508_p8, %p502_p5 }
  0x34   :  { %512 = shalt.err (!%p509_p9)
}
  0x35   :  { %55 = dma.hbm_to_vmem [thread:$0]  %s818_s2, 256, %s50_s15, [#allocation6], %s613_s21, %s613_s21, %s614_s22  }
  0x36   :  { %s513_s30 = scalar_lea.hbm %s819_s3, 256 }
  0x37   :  { %p514_p10 = scmp.ne.s32.totalorder %s819_s3, %s513_s30  ;;  %p517_p11 = scmp.lt.u32.totalorder %s513_s30, %s819_s3 }
  0x39   :  { %p519_p12 = pnand %p517_p11, %p514_p10 }
  0x3b   :  { %522 = shalt.err (!%p519_p12)
}
  0x3c   :  { %s523_s14 = scalar_lea.vmem %s709_s17, 256  ;;  %p528_p0 = scmp.lt.s32.totalorder %s709_s17, %s709_s17 }
  0x3d   :  { %p524_p13 = scmp.ne.s32.totalorder %s709_s17, %s523_s14  ;;  %p529_p1 = scmp.lt.s32.totalorder %s523_s14, %s523_s14 }
  0x3f   :  { %p530_p2 = por %p529_p1, %p528_p0 }
  0x41   :  { %p531_p3 = pnand %p530_p2, %p524_p13 }
  0x43   :  { %534 = shalt.err (!%p531_p3)
}
  0x44   :  { %67 = dma.hbm_to_vmem [thread:$0]  %s819_s3, 256, %s709_s17, [#allocation9], %s613_s21, %s613_s21, %s614_s22  }
  0x45   :  { %601 = dma.done.wait [#allocation3], 128  }
  0x46   :  { %602 = vsyncadd [#allocation3], 4294967168 }
  0x47   :  { %603 = dma.done.wait [#allocation6], 512  }
  0x48   :  { %604 = vsyncadd [#allocation6], 4294966784 }
  0x49   :  { %605 = dma.done.wait [#allocation9], 256  }
  0x4a   :  { %606 = vsyncadd [#allocation9], 4294967040  ;;  %v617_v0 = vmov 0.0   ;;  %vm618_vm0 = vmmov 0   ;;  %v440_v1 = vld [vmem:[#allocation5] sm:$0xff]   ;;  %v441_v2 = vld [vmem:[#allocation5 + $0x8] sm:$0xff]  }
  0x4b   :  { %405 = vmatprep.subr.bf16.mxu0 %v617_v0  ;;  %413 = vmatprep.subr.bf16.mxu1 %v617_v0  ;;  %v442_v3 = vld [vmem:[#allocation7] sm:$0xff]   ;;  %v443_v4 = vld [vmem:[#allocation2] sm:$0xff]   ;;  %vm117_vm1 = vcmask 261120   ;;  %v444_v6 = vld [vmem:[#allocation8] sm:$0xff]   ;;  %vm170_vm2 = vcmask 257024   ;;  %s619_s19 = smov [#allocation10]  }
  0x4c   :  { %409 = vmatprep.mubr.msk.bf16.mxu0 %vm618_vm0, %v617_v0  ;;  %417 = vmatprep.mubr.msk.bf16.mxu1 %vm618_vm0, %v617_v0  ;;  %v445_v5 = vld [vmem:[#allocation7 + $0x8] sm:$0xff]   ;;  %v446_v7 = vld [vmem:[#allocation8 + $0x8] sm:$0xff]   ;;  %s326_s20 = sshll.u32 %s619_s19, 4  ;;  %s620_s23 = smov [#allocation11]   ;;  %s327_s20 = int_to_ptr.vmem [resolvable:$true] %s326_s20 }
  0x4d   :  { %406 = vmatpush3.bf16.msra.mxu0 %v440_v1  ;;  %414 = vmatpush3.bf16.msra.mxu1 %v442_v3  ;;  %v371_v8 = vld [vmem:[%s820_s4] ss:$0 sm:$0xff]  ;;  %s338_s4 = sshll.u32 %s620_s23, 4  ;;  %s535_s25 = scalar_lea.vmem %s327_s20, 128  ;;  %s761_s4 = int_to_ptr.vmem [resolvable:$true] %s338_s4 }
  0x4e   :  { %407 = vmatprep.subr.bf16.mxu0 %v617_v0  ;;  %415 = vmatprep.subr.bf16.mxu1 %v617_v0  ;;  %v378_v10 = vld [vmem:[%s821_s5] ss:$0 sm:$0xff]  ;;  %p536_p4 = scmp.ne.s32.totalorder %s327_s20, %s535_s25  ;;  %p540_p5 = scmp.lt.s32.totalorder %s327_s20, %s327_s20 }
  0x4f   :  { %v384_v25 = vld [vmem:[%s822_s6] ss:$0 sm:$0xff]  ;;  %p541_p6 = scmp.lt.s32.totalorder %s535_s25, %s535_s25 }
  0x51   :  { %408 = vmatpush3.bf16.msra.mxu0 %v441_v2  ;;  %416 = vmatpush3.bf16.msra.mxu1 %v445_v5  ;;  %p542_p7 = por %p541_p6, %p540_p5 }
  0x52   :  { %421 = vmatprep.subr.bf16.mxu0 %v617_v0 }
  0x53   :  { %p543_p8 = pnand %p542_p7, %p536_p4 }
  0x54   :  { %410 = vmatmul.mubr.msk.bf16.vlgmr.msra.gmra.mrb[0].mxu0 %vm117_vm1, %v443_v4  ;;  %418 = vmatmul.mubr.msk.bf16.vlgmr.msra.gmra.mrb[0].mxu1 %vm117_vm1, %v443_v4 }
  0x55   :  { %422 = vmatpush3.bf16.msra.mxu0 %v444_v6  ;;  %425 = vmatprep.mubr.msk.bf16.mxu0 %vm618_vm0, %v617_v0 }
  0x56   :  { %423 = vmatprep.subr.bf16.mxu0 %v617_v0 }
  0x59   :  { %424 = vmatpush3.bf16.msra.mxu0 %v446_v7 }
  0x5c   :  { %426 = vmatmul.mubr.msk.bf16.vlgmr.msra.gmra.mrb[4].mxu0 %vm117_vm1, %v443_v4 }
 0x127   :  { %v155_v9 = vpop.f32.mrb[0].mxu0  ;;  %v230_v14 = vpop.f32.mrb[0].mxu1 }
 0x128   :  { %v156_v11 = vadd.f32 %v371_v8, %v155_v9  ;;  %v411_v12 = vpop.f32.mrb[1].mxu0  ;;  %v231_v18 = vadd.f32 %v378_v10, %v230_v14  ;;  %v419_v19 = vpop.f32.mrb[1].mxu1 }
 0x129   :  { %v158_v13 = vpop.f32.mrb[2].mxu0  ;;  %v233_v20 = vpop.f32.mrb[2].mxu1 }
 0x12a   :  { %v390_v15 = vpack.c.bf16 %v156_v11, %v156_v11  ;;  %v159_v16 = vadd.f32 %v371_v8, %v158_v13  ;;  %v412_v17 = vpop.f32.mrb[3].mxu0  ;;  %v392_v22 = vpack.c.bf16 %v231_v18, %v231_v18  ;;  %v234_v23 = vadd.f32 %v378_v10, %v233_v20  ;;  %v420_v24 = vpop.f32.mrb[3].mxu1 }
 0x12c   :  { %v391_v21 = vpack.c.bf16 %v159_v16, %v159_v16  ;;  %171 = vst.msk [vmem:[#allocation10] sm:$0xf] %vm170_vm2, %v390_v15  ;;  %v393_v26 = vpack.c.bf16 %v234_v23, %v234_v23  ;;  %245 = vst.msk [vmem:[#allocation11] sm:$0xf] %vm170_vm2, %v392_v22 }
 0x12e   :  { %172 = vst.msk [vmem:[#allocation10 + $0x4] sm:$0xf] %vm170_vm2, %v391_v21 }
 0x12f   :  { %v304_v27 = vpop.f32.mrb[4].mxu0 }
 0x130   :  { %546 = shalt.err (!%p543_p8)
}
 0x131   :  { %s547_s12 = scalar_lea.hbm %s823_s7, 128 }
 0x132   :  { %p548_p9 = scmp.ne.s32.totalorder %s823_s7, %s547_s12  ;;  %p551_p10 = scmp.lt.u32.totalorder %s547_s12, %s823_s7 }
 0x134   :  { %p553_p11 = pnand %p551_p10, %p548_p9 }
 0x136   :  { %556 = shalt.err (!%p553_p11)
}
 0x137   :  { %332 = dma.vmem_to_hbm [thread:$0]  %s327_s20, 128, %s823_s7, [#allocation4], %s613_s21, %s613_s21, %s614_s22   ;;  %v305_v28 = vadd.f32 %v384_v25, %v304_v27  ;;  %246 = vst.msk [vmem:[#allocation11 + $0x4] sm:$0xf] %vm170_vm2, %v393_v26  ;;  %v427_v29 = vpop.f32.mrb[5].mxu0 }
 0x138   :  { %s621_s13 = smov [#allocation13]   ;;  %v307_v30 = vpop.f32.mrb[6].mxu0  ;;  %s557_s10 = scalar_lea.vmem %s761_s4, 128 }
 0x139   :  { %s350_s1 = sshll.u32 %s621_s13, 4  ;;  %p558_p12 = scmp.ne.s32.totalorder %s761_s4, %s557_s10  ;;  %s351_s1 = int_to_ptr.vmem [resolvable:$true] %s350_s1 }
 0x13a   :  { %p562_p13 = scmp.lt.s32.totalorder %s761_s4, %s761_s4  ;;  %p563_p0 = scmp.lt.s32.totalorder %s557_s10, %s557_s10 }
 0x13c   :  { %p564_p1 = por %p563_p0, %p562_p13 }
 0x13e   :  { %p565_p2 = pnand %p564_p1, %p558_p12 }
 0x140   :  { %568 = shalt.err (!%p565_p2)
}
 0x141   :  { %s569_s15 = scalar_lea.hbm %s824_s8, 128 }
 0x142   :  { %p570_p3 = scmp.ne.s32.totalorder %s824_s8, %s569_s15  ;;  %p573_p4 = scmp.lt.u32.totalorder %s569_s15, %s824_s8 }
 0x144   :  { %p575_p5 = pnand %p573_p4, %p570_p3 }
 0x146   :  { %578 = shalt.err (!%p575_p5)
}
 0x147   :  { %344 = dma.vmem_to_hbm [thread:$0]  %s761_s4, 128, %s824_s8, [#allocation12], %s613_s21, %s613_s21, %s614_s22   ;;  %v394_v31 = vpack.c.bf16 %v305_v28, %v305_v28  ;;  %v308_v32 = vadd.f32 %v384_v25, %v307_v30  ;;  %v428_v33 = vpop.f32.mrb[7].mxu0 }
 0x148   :  { %s579_s20 = scalar_lea.vmem %s351_s1, 128  ;;  %p584_p7 = scmp.lt.s32.totalorder %s351_s1, %s351_s1 }
 0x149   :  { %319 = vst.msk [vmem:[#allocation13] sm:$0xf] %vm170_vm2, %v394_v31  ;;  %v395_v34 = vpack.c.bf16 %v308_v32, %v308_v32  ;;  %p580_p6 = scmp.ne.s32.totalorder %s351_s1, %s579_s20  ;;  %p585_p8 = scmp.lt.s32.totalorder %s579_s20, %s579_s20 }
 0x14b   :  { %320 = vst.msk [vmem:[#allocation13 + $0x4] sm:$0xf] %vm170_vm2, %v395_v34  ;;  %p586_p9 = por %p585_p8, %p584_p7 }
 0x14d   :  { %p587_p10 = pnand %p586_p9, %p580_p6 }
 0x14f   :  { %590 = shalt.err (!%p587_p10)
}
 0x150   :  { %s591_s8 = scalar_lea.hbm %s825_s9, 128 }
 0x151   :  { %p592_p11 = scmp.ne.s32.totalorder %s825_s9, %s591_s8  ;;  %p595_p12 = scmp.lt.u32.totalorder %s591_s8, %s825_s9 }
 0x153   :  { %p597_p13 = pnand %p595_p12, %p592_p11 }
 0x155   :  { %600 = shalt.err (!%p597_p13)
}
 0x156   :  { %356 = dma.vmem_to_hbm [thread:$0]  %s351_s1, 128, %s825_s9, [#allocation12], %s613_s21, %s613_s21, %s614_s22  }
 0x157   :  { %607 = dma.done.wait [#allocation4], 128  }
 0x158   :  { %608 = vsyncadd [#allocation4], 4294967168 }
 0x159   :  { %609 = dma.done.wait [#allocation12], 256  }
 0x15a   :  { %610 = vsyncadd [#allocation12], 4294967040 }
 0x15b   :  { %366 = vsyncpa [#allocation3], 1 }
 0x15c   :  { %367 = vsyncpa [#allocation6], 1 }
 0x15d   :  { %368 = vsyncpa [#allocation9], 1 }
 0x15e   :  { %369 = vsyncpa [#allocation4], 1 }
 0x15f   :  { %370 = vsyncpa [#allocation12], 1 }

</bundles_post_ra>
